<compile_context>
chip_gen: v5e
topology: v5e:2x2
jax: 0.10.0
libtpu: 0.0.40
codegen_flags: <defaults>
</compile_context>

<pallas_src>
import functools

import jax
import jax.numpy as jnp
from jax.experimental import pallas as pl
from jax.experimental.pallas import tpu as pltpu

_LANES = 128


def _cdiv(a, b):
    return -(-a // b)


def _round_up(a, b):
    return _cdiv(a, b) * b


def _min_sublanes(dtype):
    # Packed-dtype minimum sublane tile: f32 -> 8, bf16 -> 16, int8 -> 32.
    return max(8, 32 // jnp.dtype(dtype).itemsize)


def _wbce_partial_kernel(x_ref, t_ref, p_ref, *, weight_pos, weight_neg,
                         row_tile, tail_rows, hard_labels):
    x = x_ref[...].astype(jnp.float32)
    t = t_ref[...].astype(jnp.float32)

    if hard_labels:
        # Hard 0/1 labels: single log per element (halves EUP pushes).
        tpos = t > 0.0
        p = jnp.where(tpos, x, 1.0 - x)
        w = jnp.where(tpos, weight_pos, weight_neg)
        loss = w * jnp.maximum(jnp.log(p), -100.0)
    else:
        # Soft labels: log1p(-x) is more accurate than log(1 - x) near x ~ 1;
        # refactored form saves 1-2 VALU ops per element vs the naive sum.
        log_x = jnp.maximum(jnp.log(x), -100.0)
        log_1mx = jnp.maximum(jnp.log1p(-x), -100.0)
        neg_term = weight_neg * log_1mx
        loss = neg_term + t * (weight_pos * log_x - neg_term)

    def fold(v):
        # Fold the row tile down to one (8, 128) vreg with pure VALU adds.
        # The cross-lane/sublane reduce happens once, outside the kernel,
        # over a tiny (num_blocks*8, 128) array.
        return v.reshape(row_tile // 8, 8, _LANES).sum(axis=0)

    if tail_rows == row_tile:
        # Grid divides evenly: no block ever pays any masking cost.
        p_ref[...] = fold(loss)
    else:
        i = pl.program_id(0)
        last = pl.num_programs(0) - 1

        @pl.when(i != last)
        def _():
            p_ref[...] = fold(loss)

        @pl.when(i == last)
        def _():
            # Only the tail block masks the rows Pallas reads past the array
            # end (garbage); the mask is block-local (no int32 overflow).
            row_ids = jax.lax.broadcasted_iota(jnp.int32, (row_tile, _LANES), 0)
            p_ref[...] = fold(jnp.where(row_ids < tail_rows, loss, 0.0))


def weighted_bce_loss(inp, target, weight_pos, weight_neg, *,
                      max_row_tile=2048, hard_labels=False):
    """-mean(w_pos * t*log(x) + w_neg * (1-t)*log(1-x)) via a Pallas TPU kernel.

    `target` may be f32 soft labels, or bf16/int8 hard 0/1 labels (cast to f32
    in-kernel).  Set hard_labels=True only when targets are exactly 0/1.
    """
    assert inp.shape == target.shape
    total = int(inp.size)
    assert total > 0

    x_flat = inp.reshape(-1)
    t_flat = target.reshape(-1)  # keep caller dtype; cast in-kernel

    rows = _cdiv(total, _LANES)
    lane_pad = rows * _LANES - total
    if lane_pad:
        # Zero-loss padding (x=1, t=1): both loss formulas evaluate to exactly
        # 0 for these elements, so no mask is needed for lane padding.
        x_flat = jnp.pad(x_flat, (0, lane_pad), constant_values=1.0)
        t_flat = jnp.pad(t_flat, (0, lane_pad), constant_values=1)

    x2 = x_flat.reshape(rows, _LANES)
    t2 = t_flat.reshape(rows, _LANES)

    # Row tile: multiple of the packed-dtype sublane minimum, aiming for >= 2
    # grid blocks (v7x megacore) once the input is big enough, capped at
    # max_row_tile (VMEM / per-step-overhead sweet spot).
    sub = max(_min_sublanes(inp.dtype), _min_sublanes(target.dtype))
    half = _cdiv(rows, 2)
    row_tile = min(int(max_row_tile), _round_up(half, sub))
    row_tile = min(row_tile, _round_up(rows, sub))   # never exceed the array
    row_tile = max(row_tile, sub)

    num_blocks = _cdiv(rows, row_tile)
    tail_rows = rows - (num_blocks - 1) * row_tile

    kernel = functools.partial(
        _wbce_partial_kernel,
        weight_pos=float(weight_pos),
        weight_neg=float(weight_neg),
        row_tile=row_tile,
        tail_rows=tail_rows,
        hard_labels=bool(hard_labels),
    )

    n_padded = rows * _LANES
    cost = pl.CostEstimate(
        flops=9 * n_padded,
        transcendentals=(1 if hard_labels else 2) * n_padded,
        bytes_accessed=(x2.size * x2.dtype.itemsize
                        + t2.size * t2.dtype.itemsize
                        + num_blocks * 8 * _LANES * 4),
    )

    partials = pl.pallas_call(
        kernel,
        out_shape=jax.ShapeDtypeStruct((num_blocks * 8, _LANES), jnp.float32),
        grid=(num_blocks,),
        in_specs=[
            pl.BlockSpec((row_tile, _LANES), lambda i: (i, 0)),
            pl.BlockSpec((row_tile, _LANES), lambda i: (i, 0)),
        ],
        out_specs=pl.BlockSpec((8, _LANES), lambda i: (i, 0)),
        compiler_params=pltpu.CompilerParams(
            # Independent per-block partials -> megacore-shardable on v7x.
            dimension_semantics=("parallel",),
        ),
        cost_estimate=cost,
    )(x2, t2)

    # Final tiny reduce / negate / divide in XLA.
    return -(jnp.sum(partials) / jnp.float32(total))


if __name__ == "__main__":
    key = jax.random.PRNGKey(0)
    k1, k2, k3, k4 = jax.random.split(key, 4)

    weight_pos = 2.0
    weight_neg = 0.5

    # --- Test 1 & 2: NCHW like the PyTorch module; hard 0/1 labels as bf16
    #     (exact; halves target HBM traffic). ---
    shape = (2, 4, 16, 16)
    logits = jax.random.normal(k1, shape, dtype=jnp.float32)
    inp = jnp.clip(jax.nn.sigmoid(logits), 1e-6, 1.0 - 1e-6)
    target = (jax.random.uniform(k2, shape) > 0.5).astype(jnp.bfloat16)

    t32 = target.astype(jnp.float32)
    ref = -jnp.mean(
        weight_pos * (t32 * jnp.log(inp))
        + weight_neg * ((1.0 - t32) * jnp.log(1.0 - inp))
    )

    loss_soft = jax.block_until_ready(
        weighted_bce_loss(inp, target, weight_pos, weight_neg))
    assert jnp.allclose(loss_soft, ref, rtol=1e-5, atol=1e-6), (loss_soft, ref)

    loss_hard = jax.block_until_ready(
        weighted_bce_loss(inp, target, weight_pos, weight_neg, hard_labels=True))
    assert jnp.allclose(loss_hard, ref, rtol=1e-5, atol=1e-6), (loss_hard, ref)

    # --- Test 3: size not a multiple of 128, soft f32 labels. Exercises the
    #     zero-loss lane padding, a 2-block parallel grid, and the tail-only
    #     row mask on the partial last block. ---
    shape2 = (5, 300)
    inp2 = jnp.clip(jax.nn.sigmoid(jax.random.normal(k3, shape2, jnp.float32)),
                    1e-6, 1.0 - 1e-6)
    tgt2 = jax.random.uniform(k4, shape2, dtype=jnp.float32)
    ref2 = -jnp.mean(
        weight_pos * (tgt2 * jnp.log(inp2))
        + weight_neg * ((1.0 - tgt2) * jnp.log(1.0 - inp2))
    )
    loss2 = jax.block_until_ready(
        weighted_bce_loss(inp2, tgt2, weight_pos, weight_neg))
    assert jnp.allclose(loss2, ref2, rtol=1e-5, atol=1e-6), (loss2, ref2)

    print("KERNEL_OK")
</pallas_src>

<mosaic_0001>
module attributes {stable_mosaic.version = 11 : i64} {
  func.func @_wbce_partial_kernel(%arg0: i32, %arg1: memref<16x128xf32, #tpu.memory_space<vmem>>, %arg2: memref<16x128xbf16, #tpu.memory_space<vmem>>, %arg3: memref<8x128xf32, #tpu.memory_space<vmem>>) attributes {dimension_semantics = [#tpu.dimension_semantics<parallel>], iteration_bounds = array<i64: 1>, scalar_prefetch = 0 : i64, scratch_operands = 0 : i64, tpu.core_type = #tpu.core_type<tc>, window_params = [{transform_indices = @transform_0, window_bounds = array<i64: 16, 128>}, {transform_indices = @transform_1, window_bounds = array<i64: 16, 128>}, {transform_indices = @transform_2, window_bounds = array<i64: 8, 128>}]} {
    %c0 = arith.constant 0 : index
    %c0_0 = arith.constant 0 : index
    %0 = vector.load %arg1[%c0, %c0_0] : memref<16x128xf32, #tpu.memory_space<vmem>>, vector<16x128xf32>
    %c0_1 = arith.constant 0 : index
    %c0_2 = arith.constant 0 : index
    %1 = vector.load %arg2[%c0_1, %c0_2] : memref<16x128xbf16, #tpu.memory_space<vmem>>, vector<16x128xbf16>
    %2 = arith.extf %1 : vector<16x128xbf16> to vector<16x128xf32>
    %3 = math.log %0 : vector<16x128xf32>
    %cst = arith.constant -1.000000e+02 : f32
    %4 = vector.broadcast %cst : f32 to vector<16x128xf32>
    %5 = arith.maximumf %3, %4 : vector<16x128xf32>
    %cst_3 = arith.constant 0.000000e+00 : f32
    %6 = vector.broadcast %cst_3 : f32 to vector<16x128xf32>
    %7 = arith.subf %6, %0 : vector<16x128xf32>
    %8 = math.log1p %7 : vector<16x128xf32>
    %cst_4 = arith.constant -1.000000e+02 : f32
    %9 = vector.broadcast %cst_4 : f32 to vector<16x128xf32>
    %10 = arith.maximumf %8, %9 : vector<16x128xf32>
    %cst_5 = arith.constant 5.000000e-01 : f32
    %11 = vector.broadcast %cst_5 : f32 to vector<16x128xf32>
    %12 = arith.mulf %11, %10 : vector<16x128xf32>
    %cst_6 = arith.constant 2.000000e+00 : f32
    %13 = vector.broadcast %cst_6 : f32 to vector<16x128xf32>
    %14 = arith.mulf %13, %5 : vector<16x128xf32>
    %15 = arith.subf %14, %12 : vector<16x128xf32>
    %16 = arith.mulf %2, %15 : vector<16x128xf32>
    %17 = arith.addf %12, %16 : vector<16x128xf32>
    %18 = vector.shape_cast %17 : vector<16x128xf32> to vector<2x8x128xf32>
    %cst_7 = arith.constant dense<0.000000e+00> : vector<8x128xf32>
    %19 = vector.multi_reduction <add>, %18, %cst_7 [0] : vector<2x8x128xf32> to vector<8x128xf32>
    %c0_8 = arith.constant 0 : index
    %c0_9 = arith.constant 0 : index
    %20 = vector.load %arg3[%c0_8, %c0_9] : memref<8x128xf32, #tpu.memory_space<vmem>>, vector<8x128xf32>
    tpu.vector_store %arg3[%c0_8, %c0_9], %19 {strides = array<i32>} : memref<8x128xf32, #tpu.memory_space<vmem>>, vector<8x128xf32>,
    return
  }
  func.func @transform_0(%arg0: i32) -> (i32, i32) {
    %c0_i32 = arith.constant 0 : i32
    %c0_i32_0 = arith.constant 0 : i32
    return %arg0, %c0_i32 : i32, i32
  }
  func.func @transform_1(%arg0: i32) -> (i32, i32) {
    %c0_i32 = arith.constant 0 : i32
    %c0_i32_0 = arith.constant 0 : i32
    return %arg0, %c0_i32 : i32, i32
  }
  func.func @transform_2(%arg0: i32) -> (i32, i32) {
    %c0_i32 = arith.constant 0 : i32
    %c0_i32_0 = arith.constant 0 : i32
    return %arg0, %c0_i32 : i32, i32
  }
}

</mosaic_0001>

<bundles_post_ra>
// kernel: tpu_custom_call.1
= control target key start
LH: loop header
LB: loop body
LE: loop exit
PB: predicated region body
PF: predicated region fallthrough
CT: control target
= control target key end

     0   :  { %7 = vsyncpa [#allocation3], 0  ;;  %s236_s0 = inlined_call_operand.hbm [shape: f32[16,128], index: 0, kind: input, shape index: {}]   ;;  %s237_s1 = inlined_call_operand.hbm [shape: bf16[16,128], index: 1, kind: input, shape index: {}]   ;;  %s238_s2 = inlined_call_operand.hbm [shape: f32[8,128], index: 2, kind: output, shape index: {}]  }
   0x1   :  { %8 = vsyncpa [#allocation6], 0 }
   0x2   :  { %9 = vsyncpa [#allocation4], 0  ;;  %s14_s11 = sshll.u32 %s236_s0, 4  ;;  %s205_s12 = smov [#allocation2]   ;;  %s15_s11 = int_to_ptr.hbm [resolvable:$true] %s14_s11 }
   0x3   :  { %s16_s13 = sshll.u32 %s205_s12, 4  ;;  %s27_s16 = sshll.u32 %s237_s1, 4  ;;  %s17_s13 = int_to_ptr.vmem [resolvable:$true] %s16_s13  ;;  %s28_s16 = int_to_ptr.hbm [resolvable:$true] %s27_s16 }
   0x4   :  { %s206_s17 = smov 128   ;;  %s207_s18 = smov 8  }
   0x5   :  { %22 = dma.hbm_to_vmem [thread:$0]  %s15_s11, 256, %s17_s13, [#allocation3], %s206_s17, %s206_s17, %s207_s18  }
   0x6   :  { %s208_s19 = smov [#allocation5]   ;;  %s209_s21 = smov 64  }
   0x7   :  { %s29_s20 = sshll.u32 %s208_s19, 4  ;;  %s210_s22 = smov 4   ;;  %s30_s20 = int_to_ptr.vmem [resolvable:$true] %s29_s20 }
   0x8   :  { %35 = dma.hbm_to_vmem [thread:$0]  %s28_s16, 128, %s30_s20, [#allocation6], %s209_s21, %s209_s21, %s210_s22  }
   0x9   :  { %199 = dma.done.wait [#allocation3], 256  }
   0xa   :  { %200 = vsyncadd [#allocation3], 4294967040 }
   0xb   :  { %201 = dma.done.wait [#allocation6], 128  }
   0xc   :  { %202 = vsyncadd [#allocation6], 4294967168  ;;  %v44_v0 = vld [vmem:[#allocation2] sm:$0xff]  ;;  %v45_v1 = vld [vmem:[#allocation2 + $0x8] sm:$0xff]  ;;  %s211_s0 = smov [#allocation7]   ;;  %s97_s25 = sshll.u32 %s238_s2, 4  ;;  %s98_s25 = int_to_ptr.hbm [resolvable:$true] %s97_s25 }
   0xd   :  { %119 = vlog2.f32 %v44_v0  ;;  %v56_v2 = vsub.f32 0.0, %v44_v0  ;;  %v57_v3 = vsub.f32 0.0, %v45_v1  ;;  %v109_v24 = vld [vmem:[#allocation5] sm:$0xff]   ;;  %s95_s1 = sshll.u32 %s211_s0, 4  ;;  %s96_s1 = int_to_ptr.vmem [resolvable:$true] %s95_s1 }
   0xe   :  { %121 = vlog2.f32 %v45_v1  ;;  %v110_v31 = vunpack.c.l.bf16 %v109_v24  ;;  %v111_v33 = vunpack.c.h.bf16 %v109_v24 }
   0xf   :  { %v58_v4 = vadd.f32 1.0, %v56_v2  ;;  %v61_v5 = vmul.f32 -0.5, %v56_v2  ;;  %v67_v6 = vadd.f32 1.0, %v57_v3  ;;  %v70_v7 = vmul.f32 -0.5, %v57_v3 }
  0x10   :  { %v64_v10 = vand.u32 2147483647, %v56_v2  ;;  %v73_v14 = vand.u32 2147483647, %v57_v3 }
  0x11   :  { %123 = vlog2.f32 %v58_v4  ;;  %v62_v8 = vadd.f32 1.0, %v61_v5  ;;  %v71_v11 = vadd.f32 1.0, %v70_v7 }
  0x12   :  { %125 = vlog2.f32 %v67_v6  ;;  %vm65_vm0 = vcmp.lt.f32.partialorder %v64_v10, 0.0004427343  ;;  %vm74_vm1 = vcmp.lt.f32.partialorder %v73_v14, 0.0004427343 }
  0x13   :  { %v120_v9 = vpop.eup %119  ;;  %v63_v16 = vmul.f32 %v62_v8, %v56_v2  ;;  %v72_v19 = vmul.f32 %v71_v11, %v57_v3 }
  0x14   :  { %v122_v12 = vpop.eup %121  ;;  %v51_v13 = vmul.f32 0.6931472, %v120_v9 }
  0x15   :  { %v53_v15 = vmul.f32 0.6931472, %v122_v12 }
  0x16   :  { %v54_v18 = vmax.f32 %v51_v13, -100.0 }
  0x17   :  { %v124_v17 = vpop.eup %123  ;;  %v55_v21 = vmax.f32 %v53_v15, -100.0 }
  0x18   :  { %v126_v20 = vpop.eup %125  ;;  %v60_v22 = vmul.f32 0.6931472, %v124_v17  ;;  %v80_v28 = vmul.f32 2.0, %v54_v18 }
  0x19   :  { %v69_v23 = vmul.f32 0.6931472, %v126_v20  ;;  %v81_v30 = vmul.f32 2.0, %v55_v21 }
  0x1a   :  { %v66_v25 = vsel %vm65_vm0, %v63_v16, %v60_v22 }
  0x1b   :  { %v75_v26 = vsel %vm74_vm1, %v72_v19, %v69_v23  ;;  %v76_v27 = vmax.f32 %v66_v25, -100.0 }
  0x1c   :  { %v77_v29 = vmax.f32 %v75_v26, -100.0 }
  0x1d   :  { %v78_v32 = vmul.f32 0.5, %v76_v27 }
  0x1e   :  { %v79_v34 = vmul.f32 0.5, %v77_v29 }
  0x1f   :  { %v82_v35 = vsub.f32 %v80_v28, %v78_v32 }
  0x20   :  { %v83_v36 = vsub.f32 %v81_v30, %v79_v34 }
  0x21   :  { %v84_v37 = vmul.f32 %v110_v31, %v82_v35 }
  0x22   :  { %v85_v38 = vmul.f32 %v111_v33, %v83_v36 }
  0x23   :  { %v86_v39 = vadd.f32 %v84_v37, %v78_v32 }
  0x24   :  { %v87_v40 = vadd.f32 %v85_v38, %v79_v34 }
  0x26   :  { %v88_v41 = vadd.f32 %v87_v40, %v86_v39 }
  0x28   :  { %89 = vst [vmem:[#allocation7] sm:$0xff] %v88_v41 }
  0x29   :  { %100 = dma.vmem_to_hbm [thread:$0]  %s96_s1, 128, %s98_s25, [#allocation4]  }
  0x2a   :  { %203 = dma.done.wait [#allocation4], 128  }
  0x2b   :  { %204 = vsyncadd [#allocation4], 4294967168 }
  0x2c   :  { %105 = vsyncpa [#allocation3], 1 }
  0x2d   :  { %106 = vsyncpa [#allocation6], 1 }
  0x2e   :  { %107 = vsyncpa [#allocation4], 1 }

</bundles_post_ra>
